<compile_context>
chip_gen: v7x
topology: tpu7x:2x2x1
jax: 0.10.0
libtpu: 0.0.40
codegen_flags: <defaults>
</compile_context>

<pallas_src>
import jax
import jax.numpy as jnp
from jax.experimental import pallas as pl
from jax.experimental.pallas import tpu as pltpu


def _round_up(x, m):
    return (x + m - 1) // m * m


def _tpu_limits():
    """Per-core VMEM capacity and TensorCore count (conservative defaults)."""
    vmem_cap = 64 * 1024 * 1024   # v7x per-TC VMEM; safe lower bound everywhere
    n_cores = 1                   # v5e / v6e
    try:
        info = pltpu.get_tpu_info()
        vmem_cap = int(getattr(info, "vmem_capacity_bytes", vmem_cap))
        for name in ("num_tensorcores", "tensorcore_count", "num_cores",
                     "cores_per_chip"):
            v = getattr(info, name, None)
            if v:
                n_cores = max(1, min(int(v), 2))
                break
    except Exception:
        pass
    return vmem_cap, n_cores


def _const_weight_spec(shape, index_map, single_buffer=True):
    """BlockSpec for a constant-index (resident) weight.

    Buffered(1) halves its VMEM footprint: it is DMA'd once, so a second
    pipeline buffer is pure waste. Falls back to the default spec if this
    Pallas build lacks pipeline_mode.
    """
    if single_buffer:
        try:
            return pl.BlockSpec(shape, index_map,
                                pipeline_mode=pl.Buffered(buffer_count=1))
        except TypeError:
            pass
    return pl.BlockSpec(shape, index_map)


# ----------------------------------------------------------------------------
# Kernels
# ----------------------------------------------------------------------------

def _resident_kernel(x_ref, wi_ref, wo_ref, o_ref):
    """relu(x @ WiT) @ WoT for one batch tile; weights fully resident.

    x_ref:  [tb, F]  (compute dtype)      wi_ref: [F, H]   wo_ref: [H, F]
    o_ref:  [tb, F]  (out dtype)
    Hidden activations stay in vregs (small tb*H).
    """
    h = jnp.dot(x_ref[...], wi_ref[...], preferred_element_type=jnp.float32)
    h = jnp.maximum(h, 0.0).astype(x_ref.dtype)
    out = jnp.dot(h, wo_ref[...], preferred_element_type=jnp.float32)
    o_ref[...] = out.astype(o_ref.dtype)


def _resident_kernel_scratch(x_ref, wi_ref, wo_ref, o_ref, h_ref):
    """Same as _resident_kernel but stages relu(h) through VMEM scratch
    (used only when tb*H would not fit comfortably in the vreg file)."""
    h = jnp.dot(x_ref[...], wi_ref[...], preferred_element_type=jnp.float32)
    h_ref[...] = jnp.maximum(h, 0.0).astype(h_ref.dtype)
    out = jnp.dot(h_ref[...], wo_ref[...], preferred_element_type=jnp.float32)
    o_ref[...] = out.astype(o_ref.dtype)


def _streaming_kernel(x_ref, wi_ref, wo_ref, o_ref, h_ref):
    """Decoder-streamed variant. Grid = (batch tiles, F-output tiles).

    x_ref:  [tb, F]   wi_ref: [F, H] (resident)   wo_ref: [H, tn] (streamed)
    o_ref:  [tb, tn]  h_ref:  [tb, H] VMEM cache of relu'd hidden activations.

    The encoder runs once per batch tile (j == 0); subsequent j steps reuse
    the cached hidden activations and only stream Wo / write the output tile.
    """
    @pl.when(pl.program_id(1) == 0)
    def _():
        h = jnp.dot(x_ref[...], wi_ref[...], preferred_element_type=jnp.float32)
        h_ref[...] = jnp.maximum(h, 0.0).astype(h_ref.dtype)

    out = jnp.dot(h_ref[...], wo_ref[...], preferred_element_type=jnp.float32)
    o_ref[...] = out.astype(o_ref.dtype)


# ----------------------------------------------------------------------------
# Wrapper
# ----------------------------------------------------------------------------

def autorec_forward(x, w_i, w_o, *, tb=256, tn=512,
                    compute_dtype=jnp.bfloat16, out_dtype=jnp.float32,
                    force_streaming=False):
    """Forward pass of Autorec.

    x:   [B, F]  input (batch, input_features)
    w_i: [H, F]  fci.weight (PyTorch layout)
    w_o: [F, H]  fco.weight (PyTorch layout)
    Returns [B, F] in out_dtype (default float32, matching the module).
    """
    B, F = x.shape
    H, F2 = w_i.shape
    assert F2 == F and w_o.shape == (F, H)

    cd = jnp.dtype(compute_dtype).itemsize
    ob = jnp.dtype(out_dtype).itemsize
    sub = 16 if cd == 2 else 8            # sublane packing minimum

    vmem_cap, n_cores = _tpu_limits()
    # Keep >=16 MiB of headroom for Mosaic internal scratch / semaphores.
    vmem_budget = max(vmem_cap - 16 * 1024 * 1024, 32 * 1024 * 1024)

    # --- batch tile selection -------------------------------------------
    B_pad_min = _round_up(B, sub)
    tb = _round_up(max(sub, min(tb, B_pad_min)), sub)
    # Split into >=n_cores grid steps only on multi-TC chips (v7x); on 1-TC
    # v5e/v6e a split just adds per-step overhead and halves MXU M-fill.
    if n_cores >= 2 and B_pad_min > sub and pl.cdiv(B_pad_min, tb) < n_cores:
        tb = _round_up(pl.cdiv(B_pad_min, n_cores), sub)
    # Align large tiles to the MXU-native M dimension (256 on v6e/v7x, a
    # clean multiple of v5e's 128) so vmatmul passes stay fully occupied.
    if B >= 512 and tb % 256:
        tb = _round_up(tb, 256)
    elif B >= 256 and tb % 128:
        tb = _round_up(tb, 128)
    Bp = _round_up(B, tb)
    nb = Bp // tb

    # --- cast / pre-transpose once in the wrapper ------------------------
    # One-time HBM-side transposes remove any possibility of per-grid-step
    # XLU transposes from a transposed-RHS dot inside the kernel.
    x_c = x.astype(compute_dtype)
    if Bp != B:
        x_c = jnp.pad(x_c, ((0, Bp - B), (0, 0)))
    wi_t = w_i.T.astype(compute_dtype)    # [F, H]
    wo_t = w_o.T.astype(compute_dtype)    # [H, F]

    flops = 4 * Bp * F * H                # two matmuls, 2*B*F*H flops each

    # --- resident-weight footprint (weights single-buffered) -------------
    need_resident = (2 * F * H * cd               # Wi + Wo, Buffered(1)
                     + 2 * tb * F * cd            # x tile, double-buffered
                     + 2 * tb * F * ob            # out tile, double-buffered
                     + tb * H * 4)                # f32 hidden (vregs/VMEM)
    use_streaming = force_streaming or need_resident > vmem_budget

    if not use_streaming:
        use_h_scratch = tb * H * cd > 128 * 1024
        kernel = _resident_kernel_scratch if use_h_scratch else _resident_kernel
        scratch = ((pltpu.VMEM((tb, H), compute_dtype),) if use_h_scratch
                   else ())
        cost = pl.CostEstimate(
            flops=flops, transcendentals=0,
            bytes_accessed=Bp * F * cd + 2 * F * H * cd + Bp * F * ob)
        vmem_limit = int(min(max(int(1.5 * need_resident), 32 * 1024 * 1024),
                             vmem_budget))

        out = pl.pallas_call(
            kernel,
            out_shape=jax.ShapeDtypeStruct((Bp, F), out_dtype),
            grid_spec=pltpu.PrefetchScalarGridSpec(
                num_scalar_prefetch=0,
                grid=(nb,),
                in_specs=[
                    pl.BlockSpec((tb, F), lambda i: (i, 0)),      # x tile
                    _const_weight_spec((F, H), lambda i: (0, 0)),  # Wi^T
                    _const_weight_spec((H, F), lambda i: (0, 0)),  # Wo^T
                ],
                out_specs=pl.BlockSpec((tb, F), lambda i: (i, 0)),
                scratch_shapes=scratch,
            ),
            compiler_params=pltpu.CompilerParams(
                dimension_semantics=("parallel",),
                vmem_limit_bytes=vmem_limit),
            cost_estimate=cost,
        )(x_c, wi_t, wo_t)
        return out[:B]

    # --- streamed-decoder path (weights too big to keep both resident) ---
    tn = max(128, _round_up(min(tn, F), 128))     # lane-dense output tiles
    Fp = _round_up(F, tn)
    nj = Fp // tn
    if Fp != F:
        wo_t = jnp.pad(wo_t, ((0, 0), (0, Fp - F)))

    need_stream = (F * H * cd                     # Wi resident, Buffered(1)
                   + 2 * tb * F * cd              # x tile
                   + 2 * H * tn * cd              # streamed Wo blocks
                   + 2 * tb * tn * ob             # out tile
                   + tb * H * cd + tb * H * 4)    # cached hidden + f32 partial
    if need_stream > vmem_budget:
        # TODO(synk): add a K axis over F for the encoder (pl.when(k==0)-zeroed
        # f32 accumulator) so Wi is streamed too when F*H alone exceeds VMEM.
        raise ValueError("Autorec weights too large for the single-kernel "
                         "paths; reduce tb/tn or add encoder K-tiling.")

    cost = pl.CostEstimate(
        flops=flops, transcendentals=0,
        bytes_accessed=Bp * F * cd + F * H * cd + H * Fp * cd + Bp * Fp * ob)
    vmem_limit = int(min(max(int(1.5 * need_stream), 32 * 1024 * 1024),
                         vmem_budget))

    out = pl.pallas_call(
        _streaming_kernel,
        out_shape=jax.ShapeDtypeStruct((Bp, Fp), out_dtype),
        grid_spec=pltpu.PrefetchScalarGridSpec(
            num_scalar_prefetch=0,
            grid=(nb, nj),
            in_specs=[
                # x block index is constant across j -> fetched once per i.
                pl.BlockSpec((tb, F), lambda i, j: (i, 0)),
                _const_weight_spec((F, H), lambda i, j: (0, 0)),   # Wi^T
                # Streamed decoder weight; default double-buffering.
                # TODO(synk): sweep pl.Buffered(2..3) here on v7x.
                pl.BlockSpec((H, tn), lambda i, j: (0, j)),
            ],
            out_specs=pl.BlockSpec((tb, tn), lambda i, j: (i, j)),
            scratch_shapes=(pltpu.VMEM((tb, H), compute_dtype),),
        ),
        compiler_params=pltpu.CompilerParams(
            dimension_semantics=("parallel", "arbitrary"),
            vmem_limit_bytes=vmem_limit),
        cost_estimate=cost,
    )(x_c, wi_t, wo_t)
    return out[:B, :F]


# ----------------------------------------------------------------------------
# References
# ----------------------------------------------------------------------------

def autorec_reference_f32(x, w_i, w_o):
    h = jnp.maximum(x @ w_i.T, 0.0)
    return h @ w_o.T


def autorec_reference_mixed(x, w_i, w_o, compute_dtype=jnp.bfloat16):
    """Same bf16-input / f32-accumulate / bf16-hidden recipe as the kernel."""
    xc = x.astype(compute_dtype)
    h = jnp.dot(xc, w_i.T.astype(compute_dtype),
                preferred_element_type=jnp.float32)
    h = jnp.maximum(h, 0.0).astype(compute_dtype)
    return jnp.dot(h, w_o.T.astype(compute_dtype),
                   preferred_element_type=jnp.float32)


if __name__ == "__main__":
    # Small shapes consistent with the module: batch=48, features=256, hidden=128.
    B, F, H = 48, 256, 128
    key = jax.random.PRNGKey(0)
    kx, kw1, kw2 = jax.random.split(key, 3)

    x = jax.random.normal(kx, (B, F), dtype=jnp.float32)
    # Deterministic parameter init (Kaiming-uniform-like scale, nn.Linear default).
    w_i = jax.random.uniform(kw1, (H, F), jnp.float32, -1.0, 1.0) * (1.0 / (F ** 0.5))
    w_o = jax.random.uniform(kw2, (F, H), jnp.float32, -1.0, 1.0) * (1.0 / (H ** 0.5))

    ref_mixed = autorec_reference_mixed(x, w_i, w_o)
    ref_f32 = autorec_reference_f32(x, w_i, w_o)

    # 1) Default path: resident single-buffered bf16 weights, f32 output.
    out = jax.block_until_ready(autorec_forward(x, w_i, w_o))
    assert out.shape == (B, F) and out.dtype == jnp.float32
    assert jnp.allclose(out, ref_mixed, atol=5e-3, rtol=5e-3), \
        "resident path mismatch vs bf16-compute reference"
    assert jnp.allclose(out, ref_f32, atol=5e-2, rtol=5e-2), \
        "resident path mismatch vs f32 reference"

    # 2) Streamed-decoder path (forced; tn=128 -> 2 j-steps exercises the
    #    cached-hidden / pl.when(j==0) logic).
    out_s = jax.block_until_ready(
        autorec_forward(x, w_i, w_o, force_streaming=True, tn=128))
    assert out_s.shape == (B, F) and out_s.dtype == jnp.float32
    assert jnp.allclose(out_s, ref_mixed, atol=5e-3, rtol=5e-3), \
        "streaming path mismatch vs bf16-compute reference"

    # 3) bf16-output variant (cuts output HBM traffic; looser tolerance).
    out_b = jax.block_until_ready(
        autorec_forward(x, w_i, w_o, out_dtype=jnp.bfloat16))
    assert out_b.dtype == jnp.bfloat16
    assert jnp.allclose(out_b.astype(jnp.float32), ref_mixed,
                        atol=3e-2, rtol=3e-2), \
        "bf16-output path mismatch vs bf16-compute reference"

    print("KERNEL_OK")
</pallas_src>

<mosaic_0001>
module attributes {stable_mosaic.version = 11 : i64} {
  func.func @_resident_kernel(%arg0: i32, %arg1: memref<48x256xbf16, #tpu.memory_space<vmem>>, %arg2: memref<256x128xbf16, #tpu.memory_space<vmem>>, %arg3: memref<128x256xbf16, #tpu.memory_space<vmem>>, %arg4: memref<48x256xf32, #tpu.memory_space<vmem>>) attributes {dimension_semantics = [#tpu.dimension_semantics<parallel>], iteration_bounds = array<i64: 1>, scalar_prefetch = 0 : i64, scratch_operands = 0 : i64, tpu.core_type = #tpu.core_type<tc>, window_params = [{transform_indices = @transform_0, window_bounds = array<i64: 48, 256>}, {pipeline_mode = #tpu.pipeline_mode<synchronous>, transform_indices = @transform_1, window_bounds = array<i64: 256, 128>}, {pipeline_mode = #tpu.pipeline_mode<synchronous>, transform_indices = @transform_2, window_bounds = array<i64: 128, 256>}, {transform_indices = @transform_3, window_bounds = array<i64: 48, 256>}]} {
    %c0 = arith.constant 0 : index
    %c0_0 = arith.constant 0 : index
    %0 = vector.load %arg1[%c0, %c0_0] : memref<48x256xbf16, #tpu.memory_space<vmem>>, vector<48x256xbf16>
    %c0_1 = arith.constant 0 : index
    %c0_2 = arith.constant 0 : index
    %1 = vector.load %arg2[%c0_1, %c0_2] : memref<256x128xbf16, #tpu.memory_space<vmem>>, vector<256x128xbf16>
    %cst = arith.constant dense<0.000000e+00> : vector<48x128xf32>
    %2 = tpu.matmul %0, %1, %cst {dimension_numbers = #tpu.dot_dimension_numbers<[1], [0], [0], [1], [0, 0, 1, 1], [], []>} : vector<48x256xbf16>, vector<256x128xbf16>, vector<48x128xf32> -> vector<48x128xf32>
    %cst_3 = arith.constant 0.000000e+00 : f32
    %3 = vector.broadcast %cst_3 : f32 to vector<48x128xf32>
    %4 = arith.maximumf %2, %3 : vector<48x128xf32>
    %5 = arith.truncf %4 : vector<48x128xf32> to vector<48x128xbf16>
    %c0_4 = arith.constant 0 : index
    %c0_5 = arith.constant 0 : index
    %6 = vector.load %arg3[%c0_4, %c0_5] : memref<128x256xbf16, #tpu.memory_space<vmem>>, vector<128x256xbf16>
    %cst_6 = arith.constant dense<0.000000e+00> : vector<48x256xf32>
    %7 = tpu.matmul %5, %6, %cst_6 {dimension_numbers = #tpu.dot_dimension_numbers<[1], [0], [0], [1], [0, 0, 1, 1], [], []>} : vector<48x128xbf16>, vector<128x256xbf16>, vector<48x256xf32> -> vector<48x256xf32>
    %c0_7 = arith.constant 0 : index
    %c0_8 = arith.constant 0 : index
    %8 = vector.load %arg4[%c0_7, %c0_8] : memref<48x256xf32, #tpu.memory_space<vmem>>, vector<48x256xf32>
    tpu.vector_store %arg4[%c0_7, %c0_8], %7 {strides = array<i32>} : memref<48x256xf32, #tpu.memory_space<vmem>>, vector<48x256xf32>,
    return
  }
  func.func @transform_0(%arg0: i32) -> (i32, i32) {
    %c0_i32 = arith.constant 0 : i32
    %c0_i32_0 = arith.constant 0 : i32
    return %arg0, %c0_i32 : i32, i32
  }
  func.func @transform_1(%arg0: i32) -> (i32, i32) {
    %c0_i32 = arith.constant 0 : i32
    %c0_i32_0 = arith.constant 0 : i32
    %c0_i32_1 = arith.constant 0 : i32
    return %c0_i32, %c0_i32_0 : i32, i32
  }
  func.func @transform_2(%arg0: i32) -> (i32, i32) {
    %c0_i32 = arith.constant 0 : i32
    %c0_i32_0 = arith.constant 0 : i32
    %c0_i32_1 = arith.constant 0 : i32
    return %c0_i32, %c0_i32_0 : i32, i32
  }
  func.func @transform_3(%arg0: i32) -> (i32, i32) {
    %c0_i32 = arith.constant 0 : i32
    %c0_i32_0 = arith.constant 0 : i32
    return %arg0, %c0_i32 : i32, i32
  }
}

</mosaic_0001>

<bundles_post_ra>
// kernel: tpu_custom_call.1
= control target key start
LH: loop header
LB: loop body
LE: loop exit
PB: predicated region body
PF: predicated region fallthrough
CT: control target
= control target key end

     0   :  { %8 = vsyncpa [#allocation3], 0  ;;  %s781_s0 = inlined_call_operand.hbm [shape: bf16[48,256], index: 0, kind: input, shape index: {}]   ;;  %s782_s1 = inlined_call_operand.hbm [shape: bf16[256,128], index: 1, kind: input, shape index: {}]   ;;  %s783_s2 = inlined_call_operand.hbm [shape: bf16[128,256], index: 2, kind: input, shape index: {}]   ;;  %s784_s3 = inlined_call_operand.hbm [shape: f32[48,256], index: 3, kind: output, shape index: {}]  }
   0x1   :  { %9 = vsyncpa [#allocation6], 0 }
   0x2   :  { %10 = vsyncpa [#allocation4], 0  ;;  %s702_s12 = smov [#allocation5]   ;;  %s608_s16 = scalar_lea.hbm %s782_s1, 2048 }
   0x3   :  { %s28_s13 = sshll.u32 %s702_s12, 4  ;;  %p609_p0 = scmp.ne.s32.totalorder %s782_s1, %s608_s16  ;;  %s29_s13 = int_to_ptr.vmem [resolvable:$true] %s28_s13 }
   0x4   :  { %p612_p1 = scmp.lt.u32.totalorder %s608_s16, %s782_s1 }
   0x6   :  { %p614_p2 = pnand %p612_p1, %p609_p0 }
   0x8   :  { %617 = shalt.err (!%p614_p2)
}
   0x9   :  { %s618_s21 = scalar_lea.vmem %s29_s13, 2048  ;;  %p623_p4 = scmp.lt.s32.totalorder %s29_s13, %s29_s13 }
   0xa   :  { %p619_p3 = scmp.ne.s32.totalorder %s29_s13, %s618_s21  ;;  %p624_p5 = scmp.lt.s32.totalorder %s618_s21, %s618_s21 }
   0xc   :  { %p625_p6 = por %p624_p5, %p623_p4 }
   0xe   :  { %p626_p7 = pnand %p625_p6, %p619_p3 }
  0x10   :  { %629 = shalt.err (!%p626_p7)
}
  0x11   :  { %s703_s22 = smov 64   ;;  %s704_s23 = smov 4  }
  0x12   :  { %34 = dma.hbm_to_vmem [thread:$0]  %s782_s1, 2048, %s29_s13, [#allocation6], %s703_s22, %s703_s22, %s704_s23  }
  0x13   :  { %s705_s26 = smov [#allocation2]   ;;  %s630_s30 = scalar_lea.hbm %s781_s0, 768 }
  0x14   :  { %s16_s27 = sshll.u32 %s705_s26, 4  ;;  %p631_p8 = scmp.ne.s32.totalorder %s781_s0, %s630_s30  ;;  %s17_s27 = int_to_ptr.vmem [resolvable:$true] %s16_s27 }
  0x15   :  { %p634_p9 = scmp.lt.u32.totalorder %s630_s30, %s781_s0 }
  0x17   :  { %p636_p10 = pnand %p634_p9, %p631_p8 }
  0x19   :  { %639 = shalt.err (!%p636_p10)
}
  0x1a   :  { %s640_s8 = scalar_lea.vmem %s17_s27, 768  ;;  %p645_p12 = scmp.lt.s32.totalorder %s17_s27, %s17_s27 }
  0x1b   :  { %p641_p11 = scmp.ne.s32.totalorder %s17_s27, %s640_s8  ;;  %p646_p13 = scmp.lt.s32.totalorder %s640_s8, %s640_s8 }
  0x1d   :  { %p647_p0 = por %p646_p13, %p645_p12 }
  0x1f   :  { %p648_p1 = pnand %p647_p0, %p641_p11 }
  0x21   :  { %651 = shalt.err (!%p648_p1)
}
  0x22   :  { %s706_s1 = smov 128   ;;  %s707_s9 = smov 8  }
  0x23   :  { %22 = dma.hbm_to_vmem [thread:$0]  %s781_s0, 768, %s17_s27, [#allocation3], %s706_s1, %s706_s1, %s707_s9  }
  0x24   :  { %s708_s12 = smov [#allocation7]   ;;  %s652_s16 = scalar_lea.hbm %s783_s2, 2048 }
  0x25   :  { %s40_s13 = sshll.u32 %s708_s12, 4  ;;  %p653_p2 = scmp.ne.s32.totalorder %s783_s2, %s652_s16  ;;  %s41_s13 = int_to_ptr.vmem [resolvable:$true] %s40_s13 }
  0x26   :  { %p656_p3 = scmp.lt.u32.totalorder %s652_s16, %s783_s2 }
  0x28   :  { %p658_p4 = pnand %p656_p3, %p653_p2 }
  0x2a   :  { %661 = shalt.err (!%p658_p4)
}
  0x2b   :  { %s662_s21 = scalar_lea.vmem %s41_s13, 2048  ;;  %p667_p6 = scmp.lt.s32.totalorder %s41_s13, %s41_s13 }
  0x2c   :  { %p663_p5 = scmp.ne.s32.totalorder %s41_s13, %s662_s21  ;;  %p668_p7 = scmp.lt.s32.totalorder %s662_s21, %s662_s21 }
  0x2e   :  { %p669_p8 = por %p668_p7, %p667_p6 }
  0x30   :  { %p670_p9 = pnand %p669_p8, %p663_p5 }
  0x32   :  { %673 = shalt.err (!%p670_p9)
}
  0x33   :  { %46 = dma.hbm_to_vmem [thread:$0]  %s783_s2, 2048, %s41_s13, [#allocation6], %s706_s1, %s706_s1, %s707_s9  }
  0x34   :  { %696 = dma.done.wait [#allocation3], 768  }
  0x35   :  { %697 = vsyncadd [#allocation3], 4294966528 }
  0x36   :  { %698 = dma.done.wait [#allocation6], 4096  }
  0x37   :  { %699 = vsyncadd [#allocation6], 4294963200  ;;  %v559_v0 = vld [vmem:[#allocation5 + $0x40] sm:$0xff]   ;;  %v561_v2 = vld [vmem:[#allocation5 + $0x48] sm:$0xff]   ;;  %v709_v38 = vmov 0   ;;  %s710_s2 = smov [#allocation8]  }
  0x38   :  { %v560_v1 = vld [vmem:[#allocation5] sm:$0xff]   ;;  %514 = vmatprep.subr.bf16.mxu0 %v559_v0  ;;  %v562_v3 = vld [vmem:[#allocation5 + $0x8] sm:$0xff]   ;;  %v563_v4 = vld [vmem:[#allocation5 + $0x50] sm:$0xff]   ;;  %415 = vmatprep.mubr.bf16.mxu1 %v709_v38  ;;  %s463_s23 = sshll.u32 %s710_s2, 4  ;;  %s464_s23 = int_to_ptr.vmem [resolvable:$true] %s463_s23 }
  0x39   :  { %515 = vmatpush3.bf16.msra.mxu0 %v560_v1  ;;  %v564_v5 = vld [vmem:[#allocation5 + $0x10] sm:$0xff]   ;;  %v565_v6 = vld [vmem:[#allocation5 + $0x58] sm:$0xff]   ;;  %v567_v8 = vld [vmem:[#allocation5 + $0x60] sm:$0xff]   ;;  %s674_s24 = scalar_lea.vmem %s464_s23, 1536  ;;  %p679_p11 = scmp.lt.s32.totalorder %s464_s23, %s464_s23 }
  0x3a   :  { %516 = vmatprep.subr.bf16.mxu0 %v561_v2  ;;  %v566_v7 = vld [vmem:[#allocation5 + $0x18] sm:$0xff]   ;;  %v568_v9 = vld [vmem:[#allocation5 + $0x20] sm:$0xff]   ;;  %v569_v10 = vld [vmem:[#allocation5 + $0x68] sm:$0xff]   ;;  %p675_p10 = scmp.ne.s32.totalorder %s464_s23, %s674_s24  ;;  %p680_p12 = scmp.lt.s32.totalorder %s674_s24, %s674_s24 }
  0x3b   :  { %v577_v11 = vld [vmem:[#allocation2 + $0x4] ss:$8 sps:$4 sm:$0xff]   ;;  %v570_v12 = vld [vmem:[#allocation5 + $0x28] sm:$0xff]   ;;  %v589_v19 = vld [vmem:[#allocation7 + $0x10] ss:$8 sps:$4 sm:$0xff]  }
  0x3c   :  { %v571_v13 = vld [vmem:[#allocation5 + $0x70] sm:$0xff]   ;;  %253 = vmatprep.mubr.bf16.mxu0 %v577_v11  ;;  %v584_v14 = vld [vmem:[#allocation7 + $0x4] ss:$8 sps:$4 sm:$0xff]   ;;  %v586_v15 = vld [vmem:[#allocation7] ss:$8 sps:$4 sm:$0xff]   ;;  %p681_p13 = por %p680_p12, %p679_p11 }
  0x3d   :  { %517 = vmatpush3.bf16.msra.mxu0 %v562_v3  ;;  %v572_v16 = vld [vmem:[#allocation5 + $0x30] sm:$0xff]   ;;  %383 = vmatprep.subr.bf16.mxu1 %v584_v14  ;;  %v573_v18 = vld [vmem:[#allocation5 + $0x78] sm:$0xff]   ;;  %v590_v20 = vld [vmem:[#allocation7 + $0x24] ss:$8 sps:$4 sm:$0xff]  }
  0x3e   :  { %518 = vmatprep.subr.bf16.mxu0 %v563_v4  ;;  %v587_v17 = vld [vmem:[#allocation7 + $0x14] ss:$8 sps:$4 sm:$0xff]   ;;  %384 = vmatpush1.bf16.msra.mxu1 %v586_v15  ;;  %v592_v22 = vld [vmem:[#allocation7 + $0x20] ss:$8 sps:$4 sm:$0xff]   ;;  %v575_v24 = vld [vmem:[#allocation2] ss:$8 sps:$4 sm:$0xff]   ;;  %p682_p0 = pnand %p681_p13, %p675_p10 }
  0x3f   :  { %385 = vmatprep.subr.bf16.mxu1 %v587_v17  ;;  %v574_v21 = vld [vmem:[#allocation5 + $0x38] sm:$0xff]   ;;  %v578_v25 = vld [vmem:[#allocation2 + $0x14] ss:$8 sps:$4 sm:$0xff]   ;;  %v598_v28 = vld [vmem:[#allocation7 + $0x40] ss:$8 sps:$4 sm:$0xff]  }
  0x40   :  { %v593_v23 = vld [vmem:[#allocation7 + $0x34] ss:$8 sps:$4 sm:$0xff]   ;;  %v595_v26 = vld [vmem:[#allocation7 + $0x30] ss:$8 sps:$4 sm:$0xff]   ;;  %v596_v27 = vld [vmem:[#allocation7 + $0x44] ss:$8 sps:$4 sm:$0xff]  }
  0x41   :  { %519 = vmatpush3.bf16.msra.mxu0 %v564_v5  ;;  %v599_v29 = vld [vmem:[#allocation7 + $0x54] ss:$8 sps:$4 sm:$0xff]   ;;  %v580_v30 = vld [vmem:[#allocation2 + $0x10] ss:$8 sps:$4 sm:$0xff]   ;;  %v601_v32 = vld [vmem:[#allocation7 + $0x50] ss:$8 sps:$4 sm:$0xff]  }
  0x42   :  { %520 = vmatprep.subr.bf16.mxu0 %v565_v6  ;;  %386 = vmatpush1.bf16.msra.mxu1 %v589_v19  ;;  %v581_v31 = vld [vmem:[#allocation2 + $0x24] ss:$8 sps:$4 sm:$0xff]   ;;  %v583_v33 = vld [vmem:[#allocation2 + $0x20] ss:$8 sps:$4 sm:$0xff]   ;;  %v602_v34 = vld [vmem:[#allocation7 + $0x64] ss:$8 sps:$4 sm:$0xff]  }
  0x43   :  { %387 = vmatprep.subr.bf16.mxu1 %v590_v20  ;;  %v604_v35 = vld [vmem:[#allocation7 + $0x60] ss:$8 sps:$4 sm:$0xff]   ;;  %v605_v36 = vld [vmem:[#allocation7 + $0x74] ss:$8 sps:$4 sm:$0xff]   ;;  %v607_v37 = vld [vmem:[#allocation7 + $0x70] ss:$8 sps:$4 sm:$0xff]  }
  0x45   :  { %521 = vmatpush3.bf16.msra.mxu0 %v566_v7 }
  0x46   :  { %522 = vmatprep.subr.bf16.mxu0 %v567_v8  ;;  %388 = vmatpush1.bf16.msra.mxu1 %v592_v22 }
  0x47   :  { %389 = vmatprep.subr.bf16.mxu1 %v593_v23 }
  0x49   :  { %523 = vmatpush3.bf16.msra.mxu0 %v568_v9 }
  0x4a   :  { %524 = vmatprep.subr.bf16.mxu0 %v569_v10  ;;  %390 = vmatpush1.bf16.msra.mxu1 %v595_v26 }
  0x4b   :  { %391 = vmatprep.subr.bf16.mxu1 %v596_v27 }
  0x4d   :  { %525 = vmatpush3.bf16.msra.mxu0 %v570_v12 }
  0x4e   :  { %526 = vmatprep.subr.bf16.mxu0 %v571_v13  ;;  %392 = vmatpush1.bf16.msra.mxu1 %v598_v28 }
  0x4f   :  { %393 = vmatprep.subr.bf16.mxu1 %v599_v29 }
  0x51   :  { %527 = vmatpush3.bf16.msra.mxu0 %v572_v16 }
  0x52   :  { %528 = vmatprep.subr.bf16.mxu0 %v573_v18  ;;  %394 = vmatpush1.bf16.msra.mxu1 %v601_v32 }
  0x53   :  { %395 = vmatprep.subr.bf16.mxu1 %v602_v34 }
  0x55   :  { %529 = vmatpush3.bf16.msra.mxu0 %v574_v21 }
  0x56   :  { %396 = vmatpush1.bf16.msra.mxu1 %v604_v35 }
  0x57   :  { %397 = vmatprep.subr.bf16.mxu1 %v605_v36 }
  0x58   :  { %254 = vmatmul.mubr.bf16.vlgmr.msra.gmra.mrb[0].mxu0 %v575_v24 }
  0x59   :  { %261 = vmatprep.mubr.bf16.mxu0 %v578_v25 }
  0x5a   :  { %398 = vmatpush1.bf16.msra.mxu1 %v607_v37 }
  0x60   :  { %262 = vmatmul.mubr.bf16.gmra.mrb[4].mxu0 %v580_v30 }
  0x61   :  { %269 = vmatprep.mubr.bf16.mxu0 %v581_v31 }
  0x68   :  { %270 = vmatmul.mubr.bf16.gmra.mrb[8].mxu0 %v583_v33 }
 0x12b   :  { %v530_v39 = vpop.f32.mrb[0].mxu0 }
 0x12c   :  { %v531_v40 = vpop.f32.mrb[1].mxu0 }
 0x12d   :  { %v532_v41 = vadd.f32 %v531_v40, %v530_v39  ;;  %v533_v42 = vpop.f32.mrb[2].mxu0 }
 0x12e   :  { %v534_v43 = vpop.f32.mrb[3].mxu0 }
 0x12f   :  { %v535_v44 = vadd.f32 %v534_v43, %v533_v42  ;;  %v278_v45 = vmax.f32 %v532_v41, 0.0 }
 0x131   :  { %v279_v46 = vmax.f32 %v535_v44, 0.0 }
 0x133   :  { %v284_v47 = vpack.c.bf16 %v279_v46, %v278_v45  ;;  %v536_v48 = vpop.f32.mrb[4].mxu0 }
 0x134   :  { %v537_v49 = vpop.f32.mrb[5].mxu0 }
 0x135   :  { %v538_v50 = vadd.f32 %v537_v49, %v536_v48  ;;  %v539_v51 = vpop.f32.mrb[6].mxu0  ;;  %416 = vmatmul.mubr.bf16.vlgmr.msra.gmra.mrb[0].mxu1 %v284_v47 }
 0x136   :  { %v540_v52 = vpop.f32.mrb[7].mxu0  ;;  %425 = vmatprep.mubr.bf16.mxu1 %v709_v38 }
 0x137   :  { %v541_v53 = vadd.f32 %v540_v52, %v539_v51  ;;  %v280_v54 = vmax.f32 %v538_v50, 0.0 }
 0x139   :  { %v281_v55 = vmax.f32 %v541_v53, 0.0 }
 0x13b   :  { %v285_v56 = vpack.c.bf16 %v281_v55, %v280_v54  ;;  %v542_v57 = vpop.f32.mrb[8].mxu0 }
 0x13c   :  { %v543_v58 = vpop.f32.mrb[9].mxu0 }
 0x13d   :  { %v544_v59 = vadd.f32 %v543_v58, %v542_v57  ;;  %v545_v60 = vpop.f32.mrb[10].mxu0  ;;  %426 = vmatmul.mubr.bf16.gmra.mrb[4].mxu1 %v285_v56 }
 0x13e   :  { %v546_v61 = vpop.f32.mrb[11].mxu0  ;;  %435 = vmatprep.mubr.bf16.mxu1 %v709_v38 }
 0x13f   :  { %v547_v62 = vadd.f32 %v546_v61, %v545_v60  ;;  %v282_v63 = vmax.f32 %v544_v59, 0.0 }
 0x141   :  { %v283_v0 = vmax.f32 %v547_v62, 0.0 }
 0x143   :  { %v286_v1 = vpack.c.bf16 %v283_v0, %v282_v63 }
 0x145   :  { %436 = vmatmul.mubr.bf16.gmra.mrb[8].mxu1 %v286_v1 }
 0x208   :  { %v417_v2 = vpop.f32.mrb[0].mxu1 }
 0x209   :  { %446 = vst [vmem:[#allocation8] sm:$0xff] %v417_v2  ;;  %v419_v3 = vpop.f32.mrb[1].mxu1 }
 0x20a   :  { %447 = vst [vmem:[#allocation8 + $0x8] sm:$0xff] %v419_v3  ;;  %v421_v4 = vpop.f32.mrb[2].mxu1 }
 0x20b   :  { %448 = vst [vmem:[#allocation8 + $0x10] sm:$0xff] %v421_v4  ;;  %v423_v5 = vpop.f32.mrb[3].mxu1 }
 0x20c   :  { %449 = vst [vmem:[#allocation8 + $0x18] sm:$0xff] %v423_v5 }
 0x210   :  { %v427_v6 = vpop.f32.mrb[4].mxu1 }
 0x211   :  { %450 = vst [vmem:[#allocation8 + $0x20] sm:$0xff] %v427_v6  ;;  %v429_v7 = vpop.f32.mrb[5].mxu1 }
 0x212   :  { %451 = vst [vmem:[#allocation8 + $0x28] sm:$0xff] %v429_v7  ;;  %v431_v8 = vpop.f32.mrb[6].mxu1 }
 0x213   :  { %452 = vst [vmem:[#allocation8 + $0x30] sm:$0xff] %v431_v8  ;;  %v433_v9 = vpop.f32.mrb[7].mxu1 }
 0x214   :  { %453 = vst [vmem:[#allocation8 + $0x38] sm:$0xff] %v433_v9 }
 0x218   :  { %v437_v10 = vpop.f32.mrb[8].mxu1 }
 0x219   :  { %454 = vst [vmem:[#allocation8 + $0x40] sm:$0xff] %v437_v10  ;;  %v439_v11 = vpop.f32.mrb[9].mxu1 }
 0x21a   :  { %455 = vst [vmem:[#allocation8 + $0x48] sm:$0xff] %v439_v11  ;;  %v441_v12 = vpop.f32.mrb[10].mxu1 }
 0x21b   :  { %456 = vst [vmem:[#allocation8 + $0x50] sm:$0xff] %v441_v12  ;;  %v443_v13 = vpop.f32.mrb[11].mxu1 }
 0x21c   :  { %457 = vst [vmem:[#allocation8 + $0x58] sm:$0xff] %v443_v13 }
 0x21d   :  { %685 = shalt.err (!%p682_p0)
}
 0x21e   :  { %s686_s27 = scalar_lea.hbm %s784_s3, 1536 }
 0x21f   :  { %p687_p1 = scmp.ne.s32.totalorder %s784_s3, %s686_s27  ;;  %p690_p2 = scmp.lt.u32.totalorder %s686_s27, %s784_s3 }
 0x221   :  { %p692_p3 = pnand %p690_p2, %p687_p1 }
 0x223   :  { %695 = shalt.err (!%p692_p3)
}
 0x224   :  { %s711_s5 = smov 256   ;;  %s712_s6 = smov 16  }
 0x225   :  { %469 = dma.vmem_to_hbm [thread:$0]  %s464_s23, 1536, %s784_s3, [#allocation4], %s711_s5, %s711_s5, %s712_s6  }
 0x226   :  { %700 = dma.done.wait [#allocation4], 1536  }
 0x227   :  { %701 = vsyncadd [#allocation4], 4294965760 }
 0x228   :  { %473 = vsyncpa [#allocation3], 1 }
 0x229   :  { %474 = vsyncpa [#allocation6], 1 }
 0x22a   :  { %475 = vsyncpa [#allocation4], 1 }

</bundles_post_ra>
